<compile_context>
chip_gen: v5e
topology: v5e:2x2
jax: 0.10.0
libtpu: 0.0.40
codegen_flags: <defaults>
</compile_context>

<pallas_src>
import math

import jax
import jax.numpy as jnp
from jax.experimental import pallas as pl
from jax.experimental.pallas import tpu as pltpu


def _sinusoidal_pos_emb_kernel(x_ref, freq_ref, out_ref):
    # x_ref:    (TB, 1)           float32 in VMEM
    # freq_ref: (1, half_dim)     float32 in VMEM (grid-invariant table)
    # out_ref:  (TB, 2, half_dim) float32 in VMEM
    emb = x_ref[...] * freq_ref[...]          # (TB,1)*(1,half) -> (TB, half)
    out_ref[:, 0, :] = jnp.sin(emb)           # sin half
    out_ref[:, 1, :] = jnp.cos(emb)           # cos half


def _choose_tile_rows(b: int, dim: int) -> int:
    # Keep one output buffer around ~4 MiB so double buffering fits
    # comfortably in scoped VMEM on every generation (v5e 16 MiB default,
    # v7x 64 MiB physical).
    max_rows_by_vmem = max(8, (4 * 1024 * 1024) // max(dim * 4, 1))
    tb = min(b, 1024, max_rows_by_vmem)
    if tb < b:
        tb = max(8, (tb // 8) * 8)  # when tiling, rows must be a multiple of 8
    return tb


def sinusoidal_pos_emb(x: jax.Array, dim: int) -> jax.Array:
    """x: (B,) float timesteps -> (B, dim) sinusoidal embeddings (float32)."""
    assert dim % 2 == 0, "SinusoidalPosEmb requires an even embedding dim"
    b = x.shape[0]
    half_dim = dim // 2

    # Guard dim == 2 (half_dim == 1) against division by zero.
    emb_scale = math.log(10000.0) / (half_dim - 1) if half_dim > 1 else 0.0
    freq = jnp.exp(
        jnp.arange(half_dim, dtype=jnp.float32) * (-emb_scale)
    ).reshape(1, half_dim)

    tb = _choose_tile_rows(b, dim)
    num_tiles = pl.cdiv(b, tb)
    b_pad = num_tiles * tb

    x2d = x.astype(jnp.float32).reshape(b, 1)
    if b_pad != b:
        x2d = jnp.pad(x2d, ((0, b_pad - b), (0, 0)))

    out = pl.pallas_call(
        _sinusoidal_pos_emb_kernel,
        out_shape=jax.ShapeDtypeStruct((b_pad, 2, half_dim), jnp.float32),
        grid=(num_tiles,),
        in_specs=[
            pl.BlockSpec((tb, 1), lambda i: (i, 0)),            # timesteps tile
            pl.BlockSpec((1, half_dim), lambda i: (0, 0)),      # resident freq table
        ],
        out_specs=pl.BlockSpec((tb, 2, half_dim), lambda i: (i, 0, 0)),
        compiler_params=pltpu.CompilerParams(
            dimension_semantics=("parallel",),
        ),
    )(x2d, freq)

    # (B, 2, half_dim) -> (B, dim): row-major view == cat((sin, cos), dim=-1)
    out = out.reshape(b_pad, dim)
    if b_pad != b:
        out = out[:b]
    return out


def _reference(x: jax.Array, dim: int) -> jax.Array:
    half_dim = dim // 2
    emb_scale = math.log(10000.0) / (half_dim - 1) if half_dim > 1 else 0.0
    exp_factors = jnp.exp(jnp.arange(half_dim, dtype=jnp.float32) * -emb_scale)
    emb = jnp.einsum("b,d->bd", x.astype(jnp.float32), exp_factors)
    return jnp.concatenate([jnp.sin(emb), jnp.cos(emb)], axis=-1)


if __name__ == "__main__":
    key = jax.random.PRNGKey(0)
    B, DIM = 2, 32
    # Diffusion timesteps: small non-negative values, shape (B,).
    x = jax.random.uniform(key, (B,), dtype=jnp.float32, minval=0.0, maxval=100.0)

    out = sinusoidal_pos_emb(x, DIM)
    jax.block_until_ready(out)

    ref = _reference(x, DIM)
    assert out.shape == (B, DIM), out.shape
    assert jnp.allclose(out, ref, atol=1e-5, rtol=1e-5), "mismatch vs reference"

    print("KERNEL_OK")
</pallas_src>

<mosaic_0001>
module attributes {stable_mosaic.version = 11 : i64} {
  func.func @_sinusoidal_pos_emb_kernel(%arg0: i32, %arg1: memref<2x1xf32, #tpu.memory_space<vmem>>, %arg2: memref<1x16xf32, #tpu.memory_space<vmem>>, %arg3: memref<2x2x16xf32, #tpu.memory_space<vmem>>) attributes {dimension_semantics = [#tpu.dimension_semantics<parallel>], iteration_bounds = array<i64: 1>, scalar_prefetch = 0 : i64, scratch_operands = 0 : i64, tpu.core_type = #tpu.core_type<tc>, window_params = [{transform_indices = @transform_0, window_bounds = array<i64: 2, 1>}, {pipeline_mode = #tpu.pipeline_mode<synchronous>, transform_indices = @transform_1, window_bounds = array<i64: 1, 16>}, {transform_indices = @transform_2, window_bounds = array<i64: 2, 2, 16>}]} {
    %c0 = arith.constant 0 : index
    %c0_0 = arith.constant 0 : index
    %0 = vector.load %arg1[%c0, %c0_0] : memref<2x1xf32, #tpu.memory_space<vmem>>, vector<2x1xf32>
    %c0_1 = arith.constant 0 : index
    %c0_2 = arith.constant 0 : index
    %1 = vector.load %arg2[%c0_1, %c0_2] : memref<1x16xf32, #tpu.memory_space<vmem>>, vector<1x16xf32>
    %2 = vector.broadcast %0 : vector<2x1xf32> to vector<2x16xf32>
    %3 = vector.broadcast %1 : vector<1x16xf32> to vector<2x16xf32>
    %4 = arith.mulf %2, %3 : vector<2x16xf32>
    %5 = math.sin %4 : vector<2x16xf32>
    %c0_3 = arith.constant 0 : index
    %c0_4 = arith.constant 0 : index
    %c0_5 = arith.constant 0 : index
    %6 = vector.load %arg3[%c0_3, %c0_4, %c0_5] : memref<2x2x16xf32, #tpu.memory_space<vmem>>, vector<2x1x16xf32>
    %7 = vector.shape_cast %6 : vector<2x1x16xf32> to vector<2x16xf32>
    %8 = vector.shape_cast %5 : vector<2x16xf32> to vector<2x1x16xf32>
    tpu.vector_store %arg3[%c0_3, %c0_4, %c0_5], %8 {strides = array<i32>} : memref<2x2x16xf32, #tpu.memory_space<vmem>>, vector<2x1x16xf32>,
    %9 = math.cos %4 : vector<2x16xf32>
    %c0_6 = arith.constant 0 : index
    %c1 = arith.constant 1 : index
    %c0_7 = arith.constant 0 : index
    %10 = vector.load %arg3[%c0_6, %c1, %c0_7] : memref<2x2x16xf32, #tpu.memory_space<vmem>>, vector<2x1x16xf32>
    %11 = vector.shape_cast %10 : vector<2x1x16xf32> to vector<2x16xf32>
    %12 = vector.shape_cast %9 : vector<2x16xf32> to vector<2x1x16xf32>
    tpu.vector_store %arg3[%c0_6, %c1, %c0_7], %12 {strides = array<i32>} : memref<2x2x16xf32, #tpu.memory_space<vmem>>, vector<2x1x16xf32>,
    return
  }
  func.func @transform_0(%arg0: i32) -> (i32, i32) {
    %c0_i32 = arith.constant 0 : i32
    %c0_i32_0 = arith.constant 0 : i32
    return %arg0, %c0_i32 : i32, i32
  }
  func.func @transform_1(%arg0: i32) -> (i32, i32) {
    %c0_i32 = arith.constant 0 : i32
    %c0_i32_0 = arith.constant 0 : i32
    %c0_i32_1 = arith.constant 0 : i32
    return %c0_i32, %c0_i32_0 : i32, i32
  }
  func.func @transform_2(%arg0: i32) -> (i32, i32, i32) {
    %c0_i32 = arith.constant 0 : i32
    %c0_i32_0 = arith.constant 0 : i32
    %c0_i32_1 = arith.constant 0 : i32
    return %arg0, %c0_i32, %c0_i32_0 : i32, i32, i32
  }
}

</mosaic_0001>

<bundles_post_ra>
// kernel: tpu_custom_call.1
= control target key start
LH: loop header
LB: loop body
LE: loop exit
PB: predicated region body
PF: predicated region fallthrough
CT: control target
= control target key end

     0   :  { %v405_v1 = vmov 0   ;;  %s504_s0 = inlined_call_operand.vmem [shape: f32[2,1], index: 0, kind: input, shape index: {}]   ;;  %s505_s1 = inlined_call_operand.vmem [shape: f32[1,16], index: 1, kind: input, shape index: {}]   ;;  %s506_s2 = inlined_call_operand.hbm [shape: f32[2,2,16], index: 2, kind: output, shape index: {}]  }
   0x1   :  { %v12_v0 = vld [vmem:[%s504_s0] sm:$0x3]  ;;  %377 = vset.pattern.permute.xlu0 %v405_v1 }
   0x2   :  { %16 = vperm.xlu0 %377, %v12_v0  }
   0x3   :  { %7 = vsyncpa [#allocation3], 0  ;;  %v378_v2 = vld [vmem:[%s505_s1] ss:$0 sm:$0xff]  ;;  %v406_v16 = vmov 683565275  }
   0x4   :  { %v407_v18 = vmov 2475754826   ;;  %v408_v21 = vmov 2131351028   ;;  %v409_v24 = vmov 2102212464  }
   0x5   :  { %v410_v27 = vmov 920167782   ;;  %v411_v30 = vmov 1326507024   ;;  %vm181_vm14 = vcmask 122880   ;;  %s412_s0 = smov [#allocation2]  }
   0x6   :  { %s347_s1 = sshll.u32 %s412_s0, 4  ;;  %s349_s15 = sshll.u32 %s506_s2, 4  ;;  %s348_s1 = int_to_ptr.vmem [resolvable:$true] %s347_s1  ;;  %s350_s15 = int_to_ptr.hbm [resolvable:$true] %s349_s15 }
   0x7   :  { %s413_s16 = smov 32   ;;  %s414_s2 = smov 2  }
  0x74   :  { %v17_v3 = vpop.permute.xlu0 %16 }
  0x75   :  { %v437_v4 = vmul.f32 %v378_v2, %v17_v3 }
  0x77   :  { %v26_v5 = vand.u32 2139095040, %v437_v4  ;;  %v23_v8 = vand.u32 2147483647, %v437_v4  ;;  %vm25_vm12 = vcmp.lt.s32.totalorder %v437_v4, 0 }
  0x79   :  { %v27_v6 = vshrl.u32 %v26_v5, 23  ;;  %v30_v10 = vand.u32 8388607, %v23_v8  ;;  %vm24_vm13 = vcmp.le.f32.partialorder %v23_v8, 0.7853982 }
  0x7b   :  { %v361_v7 = vadd.s32 4294967169, %v27_v6  ;;  %v31_v14 = vor.u32 8388608, %v30_v10 }
  0x7d   :  { %v33_v9 = vadd.s32 1, %v361_v7  ;;  %v454_v37 = vshll.u32 %v31_v14, 8 }
  0x7f   :  { %vm34_vm0 = vcmp.gt.s32.totalorder %v33_v9, 0  ;;  %v72_v46 = vand.u32 65535, %v454_v37  ;;  %v73_v47 = vshrl.u32 %v454_v37, 16 }
  0x80   :  { %v35_v11 = vsel %vm34_vm0, %v33_v9, 0 }
  0x81   :  { %v37_v12 = vand.u32 31, %v35_v11  ;;  %v445_v15 = vshrl.u32 %v35_v11, 5 }
  0x83   :  { %v443_v13 = vsub.s32 32, %v37_v12  ;;  %v40_v17 = vshll.u32 %v406_v16, %v37_v12  ;;  %v43_v19 = vshll.u32 %v407_v18, %v37_v12  ;;  %v46_v23 = vshll.u32 %v408_v21, %v37_v12 }
  0x84   :  { %v49_v26 = vshll.u32 %v409_v24, %v37_v12  ;;  %v52_v29 = vshll.u32 %v410_v27, %v37_v12  ;;  %vm55_vm1 = vcmp.lt.s32.totalorder %v445_v15, 1  ;;  %vm58_vm2 = vcmp.lt.s32.totalorder %v445_v15, 4 }
  0x85   :  { %v41_v20 = vshrl.u32 %v407_v18, %v443_v13  ;;  %v44_v22 = vshrl.u32 %v408_v21, %v443_v13  ;;  %v47_v25 = vshrl.u32 %v409_v24, %v443_v13  ;;  %v50_v28 = vshrl.u32 %v410_v27, %v443_v13 }
  0x86   :  { %v53_v31 = vshrl.u32 %v411_v30, %v443_v13  ;;  %vm57_vm3 = vcmp.lt.s32.totalorder %v445_v15, 3  ;;  %vm56_vm4 = vcmp.lt.s32.totalorder %v445_v15, 2  ;;  %v39_v11 = vshrl.u32 %v406_v16, %v443_v13 }
  0x87   :  { %v42_v32 = vor.u32 %v41_v20, %v40_v17  ;;  %v45_v33 = vor.u32 %v44_v22, %v43_v19  ;;  %v48_v34 = vor.u32 %v47_v25, %v46_v23  ;;  %v51_v35 = vor.u32 %v50_v28, %v49_v26 }
  0x88   :  { %v54_v36 = vor.u32 %v53_v31, %v52_v29 }
  0x89   :  { %v63_v38 = vsel %vm55_vm1, %v42_v32, %v45_v33  ;;  %v67_v39 = vsel %vm55_vm1, %v45_v33, %v48_v34  ;;  %v64_v40 = vsel %vm58_vm2, %v51_v35, 920167782  ;;  %v60_v7 = vsel %vm58_vm2, %v48_v34, 2102212464 }
  0x8a   :  { %v68_v41 = vsel %vm58_vm2, %v54_v36, 1326507024  ;;  %v65_v42 = vsel %vm57_vm3, %v48_v34, %v64_v40  ;;  %v59_v20 = vsel %vm55_vm1, %v39_v11, %v42_v32  ;;  %v61_v21 = vsel %vm57_vm3, %v45_v33, %v60_v7 }
  0x8b   :  { %v69_v43 = vsel %vm57_vm3, %v51_v35, %v68_v41  ;;  %v66_v44 = vsel %vm56_vm4, %v63_v38, %v65_v42  ;;  %v62_v13 = vsel %vm56_vm4, %v59_v20, %v61_v21 }
  0x8c   :  { %v70_v45 = vsel %vm56_vm4, %v67_v39, %v69_v43  ;;  %v96_v50 = vand.u32 65535, %v66_v44  ;;  %v97_v51 = vshrl.u32 %v66_v44, 16  ;;  %v116_v28 = vmul.u32 %v454_v37, %v62_v13 }
  0x8d   :  { %v74_v48 = vand.u32 65535, %v70_v45  ;;  %v75_v49 = vshrl.u32 %v70_v45, 16 }
  0x8e   :  { %v99_v54 = vmul.u32 %v97_v51, %v72_v46  ;;  %v100_v55 = vmul.u32 %v96_v50, %v73_v47  ;;  %v98_v59 = vmul.u32 %v96_v50, %v72_v46  ;;  %v101_v63 = vmul.u32 %v97_v51, %v73_v47 }
  0x8f   :  { %v77_v52 = vmul.u32 %v75_v49, %v72_v46  ;;  %v78_v53 = vmul.u32 %v74_v48, %v73_v47  ;;  %v76_v56 = vmul.u32 %v74_v48, %v72_v46  ;;  %v79_v58 = vmul.u32 %v75_v49, %v73_v47 }
  0x90   :  { %v102_v60 = vshll.u32 %v99_v54, 16  ;;  %v104_v2 = vshll.u32 %v100_v55, 16  ;;  %v103_v18 = vshrl.u32 %v99_v54, 16  ;;  %v105_v24 = vshrl.u32 %v100_v55, 16 }
  0x91   :  { %v80_v57 = vshll.u32 %v77_v52, 16  ;;  %v82_v61 = vshll.u32 %v78_v53, 16  ;;  %v81_v12 = vshrl.u32 %v77_v52, 16  ;;  %v83_v22 = vshrl.u32 %v78_v53, 16 }
  0x92   :  { %vm106_vm6 = vc.u32 %v98_v59, %v102_v60  ;;  %v108_v3 = vadd.s32 %v102_v60, %v98_v59 }
  0x93   :  { %vm84_vm5 = vc.u32 %v76_v56, %v80_v57  ;;  %v86_v62 = vadd.s32 %v80_v57, %v76_v56  ;;  %v107_v6 = vsel %vm106_vm6, 1, %v405_v1 }
  0x94   :  { %v85_v0 = vsel %vm84_vm5, 1, %v405_v1  ;;  %v109_v10 = vadd.s32 %v107_v6, %v101_v63  ;;  %vm110_vm8 = vc.u32 %v108_v3, %v104_v2  ;;  %v112_v27 = vadd.s32 %v108_v3, %v104_v2 }
  0x95   :  { %v87_v5 = vadd.s32 %v85_v0, %v79_v58  ;;  %vm88_vm7 = vc.u32 %v86_v62, %v82_v61  ;;  %v111_v17 = vsel %vm110_vm8, 1, %v405_v1  ;;  %vm166_vm5 = vweird.f32 %v437_v4 }
  0x96   :  { %v89_v9 = vsel %vm88_vm7, 1, %v405_v1  ;;  %v113_v19 = vadd.s32 %v111_v17, %v109_v10 }
  0x97   :  { %v91_v14 = vadd.s32 %v89_v9, %v87_v5 }
  0x98   :  { %v114_v25 = vadd.s32 %v113_v19, %v103_v18 }
  0x99   :  { %v92_v23 = vadd.s32 %v91_v14, %v81_v12 }
  0x9a   :  { %v115_v16 = vadd.s32 %v114_v25, %v105_v24 }
  0x9b   :  { %v93_v26 = vadd.s32 %v92_v23, %v83_v22 }
  0x9c   :  { %v119_v1 = vadd.s32 1, %v115_v16 }
  0x9d   :  { %vm118_vm9 = vc.u32 %v93_v26, %v112_v27  ;;  %v117_v15 = vadd.s32 %v112_v27, %v93_v26 }
  0x9e   :  { %v120_v29 = vsel %vm118_vm9, %v119_v1, %v115_v16 }
  0x9f   :  { %v121_v30 = vadd.s32 %v120_v29, %v116_v28 }
  0xa1   :  { %v122_v31 = vadd.s32 536870912, %v121_v30 }
  0xa3   :  { %v123_v32 = vshrl.u32 %v122_v31, 30 }
  0xa5   :  { %v124_v34 = vshll.u32 %v123_v32, 30  ;;  %v147_v53 = vsub.s32 4, %v123_v32 }
  0xa7   :  { %v125_v33 = vsub.s32 %v121_v30, %v124_v34  ;;  %v148_v58 = vsel %vm25_vm12, %v147_v53, %v123_v32 }
  0xa8   :  { %v150_v61 = vsel %vm24_vm13, 0, %v148_v58 }
  0xa9   :  { %vm126_vm10 = vcmp.lt.s32.totalorder %v125_v33, 0  ;;  %v127_v35 = vsub.s32 0, %v125_v33  ;;  %v167_v3 = vadd.s32 3, %v150_v61  ;;  %v328_v9 = vand.u32 3, %v150_v61 }
  0xab   :  { %v128_v36 = vsel %vm126_vm10, %v127_v35, %v125_v33  ;;  %v168_v10 = vand.u32 3, %v167_v3  ;;  %vm329_vm15 = vcmp.lt.s32.totalorder %v328_v9, 2  ;;  %vm330_vm0 = vcmp.eq.s32.totalorder %v328_v9, 0 }
  0xac   :  { %v129_v38 = vclz %v128_v36  ;;  %vm333_vm4 = vcmp.eq.s32.totalorder %v328_v9, 2 }
  0xad   :  { %vm169_vm1 = vcmp.lt.s32.totalorder %v168_v10, 2  ;;  %vm170_vm2 = vcmp.eq.s32.totalorder %v168_v10, 0  ;;  %vm173_vm3 = vcmp.eq.s32.totalorder %v168_v10, 2 }
  0xae   :  { %v362_v39 = vadd.s32 4294967294, %v129_v38 }
  0xb0   :  { %vm363_vm11 = vcmp.lt.s32.totalorder %v362_v39, 0 }
  0xb1   :  { %v132_v40 = vsel %vm363_vm11, 0, %v362_v39 }
  0xb2   :  { %v133_v41 = vsub.s32 32, %v132_v40  ;;  %v137_v42 = vsub.s32 4294967266, %v132_v40  ;;  %v134_v43 = vshll.u32 %v125_v33, %v132_v40 }
  0xb4   :  { %v135_v44 = vshrl.u32 %v117_v15, %v133_v41  ;;  %v138_v45 = vadd.s32 127, %v137_v42 }
  0xb6   :  { %v136_v37 = vor.u32 %v135_v44, %v134_v43  ;;  %v139_v46 = vshll.u32 %v138_v45, 23 }
  0xb8   :  { %v140_v47 = vor.u32 4788187, %v139_v46  ;;  %v143_v49 = vcvt.s32.f32 %v136_v37 }
  0xba   :  { %v141_v48 = vand.u32 2147483647, %v140_v47 }
  0xbc   :  { %v144_v50 = vmul.f32 %v143_v49, %v141_v48 }
  0xbe   :  { %v145_v51 = vxor.u32 2147483648, %v144_v50 }
  0xc0   :  { %v146_v52 = vsel %vm25_vm12, %v145_v51, %v144_v50 }
  0xc1   :  { %v149_v54 = vsel %vm24_vm13, %v437_v4, %v146_v52 }
  0xc2   :  { %v151_v55 = vmul.f32 %v149_v54, %v149_v54 }
  0xc4   :  { %v152_v56 = vmul.f32 -0.001358992, %v151_v55  ;;  %v159_v57 = vmul.f32 -0.00019511016, %v151_v55 }
  0xc6   :  { %v153_v59 = vadd.f32 0.041655596, %v152_v56  ;;  %v160_v60 = vadd.f32 0.008332121, %v159_v57 }
  0xc8   :  { %v154_v62 = vmul.f32 %v153_v59, %v151_v55  ;;  %v161_v63 = vmul.f32 %v160_v60, %v151_v55 }
  0xca   :  { %v155_v0 = vadd.f32 -0.4999988, %v154_v62  ;;  %v162_v2 = vadd.f32 -0.16666654, %v161_v63 }
  0xcc   :  { %v156_v5 = vmul.f32 %v155_v0, %v151_v55  ;;  %v163_v6 = vmul.f32 %v162_v2, %v151_v55 }
  0xce   :  { %v157_v7 = vadd.f32 1.0, %v156_v5  ;;  %v164_v8 = vadd.f32 1.0, %v163_v6 }
  0xd0   :  { %v165_v11 = vmul.f32 %v164_v8, %v149_v54  ;;  %v174_v12 = vxor.u32 2147483648, %v157_v7 }
  0xd2   :  { %v171_v14 = vxor.u32 2147483648, %v165_v11  ;;  %v175_v18 = vsel %vm173_vm3, %v174_v12, %v165_v11  ;;  %v335_v20 = vsel %vm333_vm4, %v174_v12, %v165_v11 }
  0xd4   :  { %v172_v17 = vsel %vm170_vm2, %v157_v7, %v171_v14  ;;  %v332_v19 = vsel %vm330_vm0, %v157_v7, %v171_v14 }
  0xd5   :  { %v176_v21 = vsel %vm169_vm1, %v172_v17, %v175_v18  ;;  %v336_v22 = vsel %vm329_vm15, %v332_v19, %v335_v20 }
  0xd6   :  { %v177_v23 = vsel %vm166_vm5, nan, %v176_v21  ;;  %v337_v24 = vsel %vm166_vm5, nan, %v336_v22 }
  0xd7   :  { %v179_v25 = vrot.slane %v177_v23, 1  ;;  %182 = vst.msk [vmem:[#allocation2] sm:$0x1] %vm181_vm14, %v177_v23  ;;  %v339_v26 = vrot.slane %v337_v24, 1 }
  0xd8   :  { %341 = vst.msk [vmem:[#allocation2 + $0x1] sm:$0x1] %vm181_vm14, %v337_v24 }
  0xd9   :  { %183 = vst.msk [vmem:[#allocation2 + $0x2] sm:$0x1] %vm181_vm14, %v179_v25 }
  0xda   :  { %342 = vst.msk [vmem:[#allocation2 + $0x3] sm:$0x1] %vm181_vm14, %v339_v26 }
  0xdb   :  { %355 = dma.vmem_to_hbm [thread:$0]  %s348_s1, 64, %s350_s15, [#allocation3], %s413_s16, %s413_s16, %s414_s2  }
  0xdc   :  { %403 = dma.done.wait [#allocation3], 64  }
  0xdd   :  { %404 = vsyncadd [#allocation3], 4294967232 }
  0xde   :  { %360 = vsyncpa [#allocation3], 1 }

</bundles_post_ra>
